<compile_context>
chip_gen: v6e
topology: v6e:2x2x1
jax: 0.10.0
libtpu: 0.0.40
codegen_flags: <defaults>
</compile_context>

<pallas_src>
import functools

import jax
import jax.numpy as jnp
from jax.experimental import pallas as pl
from jax.experimental.pallas import tpu as pltpu


# -----------------------------------------------------------------------------
# Fused kernel:
#   grid = (batch_blocks ["parallel"], K item-tiles ["arbitrary" reduction])
#   acc  = sum_k  x[:, k] @ W_enc^T[k, :]          (f32 VMEM scratch)
#   last k:  h = relu(acc + (user_emb + b_enc));  out = h @ W_dec^T + b_dec
# -----------------------------------------------------------------------------
def fused_cdae_kernel(x_ref, wenc_ref, emb_ref, wdec_ref, bdec_ref, out_ref, acc_ref):
    k = pl.program_id(1)

    @pl.when(k == 0)
    def _():
        acc_ref[...] = jnp.zeros_like(acc_ref)

    # Encoder partial sum over this input-item tile.
    acc_ref[...] += jnp.dot(x_ref[...], wenc_ref[...],
                            preferred_element_type=jnp.float32)

    # Last reduction step: finish the encoder (bias already folded into emb_ref,
    # ReLU) and run the decoder while h is still resident in VMEM.
    @pl.when(k == pl.num_programs(1) - 1)
    def _():
        h = jnp.maximum(acc_ref[...] + emb_ref[...], 0.0).astype(jnp.bfloat16)
        out = jnp.dot(h, wdec_ref[...], preferred_element_type=jnp.float32)
        out_ref[...] = (out + bdec_ref[...]).astype(out_ref.dtype)


# -----------------------------------------------------------------------------
# Sizing helpers (VMEM-budget aware, generation aware)
# -----------------------------------------------------------------------------
def _vmem_capacity_bytes():
    try:
        return int(pltpu.get_tpu_info().vmem_capacity_bytes)
    except Exception:
        return 64 << 20  # v7x per-core VMEM: safe lower bound across generations


def _tensorcores_per_chip():
    try:
        kind = jax.devices()[0].device_kind.lower()
    except Exception:
        return 1
    # v7x (and older v4 / v5p megacore parts) expose 2 TensorCores per chip;
    # v5e / v6e have a single TensorCore.
    return 2 if ("v7" in kind or "v4" in kind or "v5p" in kind) else 1


def _fused_vmem_bytes(bb, tk, hidden, num_items, xb, wb):
    # Conservative: count 2 pipeline buffers for every BlockSpec'd operand,
    # 1 for the accumulator scratch.
    return (2 * bb * tk * xb                 # x tiles (streamed)
            + 2 * tk * hidden * wb           # W_enc^T tiles (streamed)
            + 2 * bb * hidden * 4            # user_emb + b_enc (resident)
            + 2 * hidden * num_items * wb    # W_dec^T (resident)
            + 2 * num_items * 4              # b_dec (resident)
            + 2 * bb * num_items * 4         # output block (resident)
            + bb * hidden * 4)               # f32 accumulator scratch


def _pick_k_tile(num_items, bb, hidden, xb, wb, budget):
    # Largest 128-multiple divisor of num_items whose footprint fits `budget`;
    # biggest tile => fewest grid steps (fixed ~0.35 us/step dominates at small sizes).
    candidates = [num_items] + [t for t in range(num_items - 128, 0, -128)
                                if num_items % t == 0]
    for tk in candidates:
        if _fused_vmem_bytes(bb, tk, hidden, num_items, xb, wb) <= budget:
            return tk
    return None


# -----------------------------------------------------------------------------
# Wrapper: one fused, pipelined pallas_call
# -----------------------------------------------------------------------------
def cdae_forward_pallas(x, w_enc_t, emb_plus_benc, w_dec_t, b_dec):
    """Single-CDAE forward: fused encoder+decoder Pallas kernel (h stays in VMEM)."""
    B, num_items = x.shape
    hidden = w_enc_t.shape[1]
    assert num_items % 128 == 0 and hidden % 128 == 0 and B % 8 == 0, (
        "pad item/hidden dims to multiples of 128 and batch to a multiple of 8")

    xb = jnp.dtype(x.dtype).itemsize          # 2 (bf16 input)
    wb = jnp.dtype(w_enc_t.dtype).itemsize    # 2 (bf16 weights)

    vmem_cap = _vmem_capacity_bytes()
    tile_budget = int(0.45 * vmem_cap)

    # Megacore: split the batch across TensorCores only when there is more than
    # one (on single-TC chips an extra grid step is pure overhead).
    nb = 2 if (_tensorcores_per_chip() == 2 and B % 16 == 0) else 1
    bb = B // nb

    tk = _pick_k_tile(num_items, bb, hidden, xb, wb, tile_budget)
    assert tk is not None, (
        "W_dec^T / output block do not fit in VMEM at this num_items; "
        "TODO(synk): add an output-item-tiled decoder variant for very large catalogs")
    kt = num_items // tk

    usage = _fused_vmem_bytes(bb, tk, hidden, num_items, xb, wb)
    vmem_limit = int(min(0.85 * vmem_cap, max(usage + (4 << 20), 32 << 20)))

    out = pl.pallas_call(
        fused_cdae_kernel,
        out_shape=jax.ShapeDtypeStruct((B, num_items), jnp.float32),
        grid=(nb, kt),
        in_specs=[
            pl.BlockSpec((bb, tk), lambda b, k: (b, k)),             # x tile
            pl.BlockSpec((tk, hidden), lambda b, k: (k, 0)),         # W_enc^T tile
            pl.BlockSpec((bb, hidden), lambda b, k: (b, 0)),         # user_emb + b_enc
            pl.BlockSpec((hidden, num_items), lambda b, k: (0, 0)),  # W_dec^T (resident)
            pl.BlockSpec((1, num_items), lambda b, k: (0, 0)),       # b_dec (resident)
        ],
        out_specs=pl.BlockSpec((bb, num_items), lambda b, k: (b, 0)),
        scratch_shapes=[pltpu.VMEM((bb, hidden), jnp.float32)],
        compiler_params=pltpu.CompilerParams(
            dimension_semantics=("parallel", "arbitrary"),
            vmem_limit_bytes=vmem_limit),
        cost_estimate=pl.CostEstimate(
            flops=4 * B * num_items * hidden,        # encoder + decoder matmuls
            transcendentals=0,
            bytes_accessed=(B * num_items * xb              # x
                            + 2 * num_items * hidden * wb   # both weight matrices
                            + B * hidden * 4                # emb (+b_enc)
                            + num_items * 4                 # b_dec
                            + B * num_items * 4)),          # output
    )(x, w_enc_t, emb_plus_benc, w_dec_t, b_dec)
    return out


# -----------------------------------------------------------------------------
# CombinedNetwork: parameter construction + model selection glue
# -----------------------------------------------------------------------------
def xavier_normal(key, fan_a, fan_b, shape):
    std = (2.0 / (fan_a + fan_b)) ** 0.5
    return std * jax.random.normal(key, shape, dtype=jnp.float32)


def init_combined_network(key, user_num, item_num, factor_num, num_models):
    """Stacked params for `num_models` CDAE models.

    Weights are stored pre-transposed ([I,H] / [H,I]) in bfloat16 so the forward
    pass issues zero per-call transposes and half the HBM weight bytes.
    """
    p = {"user_embedding": [], "w_enc_t": [], "b_enc": [], "w_dec_t": [], "b_dec": []}
    for _ in range(num_models):
        key, k_emb, k_enc, k_dec, k_be, k_bd = jax.random.split(key, 6)
        p["user_embedding"].append(
            xavier_normal(k_emb, user_num, factor_num, (user_num, factor_num)))
        # encoder Linear(num_items -> factor_num): torch weight [H, I]; store W^T = [I, H]
        p["w_enc_t"].append(
            xavier_normal(k_enc, item_num, factor_num,
                          (item_num, factor_num)).astype(jnp.bfloat16))
        # decoder Linear(factor_num -> num_items): torch weight [I, H]; store W^T = [H, I]
        p["w_dec_t"].append(
            xavier_normal(k_dec, factor_num, item_num,
                          (factor_num, item_num)).astype(jnp.bfloat16))
        # Linear biases keep PyTorch default init: U(-1/sqrt(fan_in), 1/sqrt(fan_in))
        p["b_enc"].append(jax.random.uniform(
            k_be, (factor_num,), jnp.float32,
            -1.0 / item_num ** 0.5, 1.0 / item_num ** 0.5))
        p["b_dec"].append(jax.random.uniform(
            k_bd, (item_num,), jnp.float32,
            -1.0 / factor_num ** 0.5, 1.0 / factor_num ** 0.5))
    return {k: jnp.stack(v, axis=0) for k, v in p.items()}


@functools.partial(jax.jit, static_argnames=("model_id",))
def combined_network_forward(params, user, data, model_id):
    """Equivalent of CombinedNetwork.forward(user, data, model_id) (dropout = identity)."""
    w_enc_t = params["w_enc_t"][model_id]                  # [I, H] bf16 (pre-transposed)
    w_dec_t = params["w_dec_t"][model_id]                  # [H, I] bf16 (pre-transposed)
    b_dec = params["b_dec"][model_id][None, :]             # [1, I] f32
    # Fold the encoder bias into the gathered user embedding (tiny [B,H] f32 add);
    # drops one streamed operand from the kernel.
    emb = (params["user_embedding"][model_id][user]
           + params["b_enc"][model_id][None, :])           # [B, H] f32
    x = data.astype(jnp.bfloat16)                          # 0/1 interactions: exact in bf16
    return cdae_forward_pallas(x, w_enc_t, emb, w_dec_t, b_dec)


# -----------------------------------------------------------------------------
# Pure-JAX reference (same bf16 weights, f32 accumulation) for sanity checking
# -----------------------------------------------------------------------------
def reference_forward(params, user, data, model_id):
    emb = params["user_embedding"][model_id][user]
    x = data.astype(jnp.bfloat16)
    h = jnp.dot(x, params["w_enc_t"][model_id], preferred_element_type=jnp.float32)
    h = jnp.maximum(h + params["b_enc"][model_id][None, :] + emb, 0.0)
    h = h.astype(jnp.bfloat16)
    out = jnp.dot(h, params["w_dec_t"][model_id], preferred_element_type=jnp.float32)
    return out + params["b_dec"][model_id][None, :]


if __name__ == "__main__":
    # Small shapes consistent with the module (item/hidden dims 128-aligned,
    # batch a multiple of 16 so the v7x batch-parallel split stays (8,128)-legal).
    user_num = 32      # num_users
    item_num = 512     # num_items
    factor_num = 128   # hidden_dim
    dropout = 0.2      # corruption_ratio (identity at inference)
    num_models = 2
    batch = 64

    key = jax.random.PRNGKey(0)
    key, k_params, k_user, k_data = jax.random.split(key, 4)

    params = init_combined_network(k_params, user_num, item_num, factor_num, num_models)

    user = jax.random.randint(k_user, (batch,), 0, user_num, dtype=jnp.int32)
    # Binary interaction matrix (typical CDAE input).
    data = (jax.random.uniform(k_data, (batch, item_num)) < 0.3).astype(jnp.float32)

    model_id = 1
    out = combined_network_forward(params, user, data, model_id)
    out = jax.block_until_ready(out)

    ref = reference_forward(params, user, data, model_id)
    assert out.shape == (batch, item_num)
    assert out.dtype == jnp.float32
    assert jnp.allclose(out, ref, atol=1e-2, rtol=1e-2), "Pallas output mismatch vs reference"

    print("KERNEL_OK")
</pallas_src>

<mosaic_0001>
module attributes {stable_mosaic.version = 11 : i64} {
  func.func @fused_cdae_kernel(%arg0: i32, %arg1: i32, %arg2: memref<64x512xbf16, #tpu.memory_space<vmem>>, %arg3: memref<512x128xbf16, #tpu.memory_space<vmem>>, %arg4: memref<64x128xf32, #tpu.memory_space<vmem>>, %arg5: memref<128x512xbf16, #tpu.memory_space<vmem>>, %arg6: memref<1x512xf32, #tpu.memory_space<vmem>>, %arg7: memref<64x512xf32, #tpu.memory_space<vmem>>, %arg8: memref<64x128xf32, #tpu.memory_space<vmem>>) attributes {dimension_semantics = [#tpu.dimension_semantics<parallel>, #tpu.dimension_semantics<arbitrary>], iteration_bounds = array<i64: 1, 1>, scalar_prefetch = 0 : i64, scratch_operands = 1 : i64, tpu.core_type = #tpu.core_type<tc>, window_params = [{transform_indices = @transform_0, window_bounds = array<i64: 64, 512>}, {transform_indices = @transform_1, window_bounds = array<i64: 512, 128>}, {transform_indices = @transform_2, window_bounds = array<i64: 64, 128>}, {pipeline_mode = #tpu.pipeline_mode<synchronous>, transform_indices = @transform_3, window_bounds = array<i64: 128, 512>}, {pipeline_mode = #tpu.pipeline_mode<synchronous>, transform_indices = @transform_4, window_bounds = array<i64: 1, 512>}, {transform_indices = @transform_5, window_bounds = array<i64: 64, 512>}]} {
    %c0_i32 = arith.constant 0 : i32
    %0 = arith.cmpi eq, %arg1, %c0_i32 : i32
    %1 = arith.extui %0 : i1 to i32
    %c0_i32_0 = arith.constant 0 : i32
    %2 = arith.cmpi ne, %1, %c0_i32_0 : i32
    scf.if %2 {
      %cst_10 = arith.constant 0.000000e+00 : f32
      %12 = vector.broadcast %cst_10 : f32 to vector<64x128xf32>
      %c0_11 = arith.constant 0 : index
      %c0_12 = arith.constant 0 : index
      %13 = vector.load %arg8[%c0_11, %c0_12] : memref<64x128xf32, #tpu.memory_space<vmem>>, vector<64x128xf32>
      tpu.vector_store %arg8[%c0_11, %c0_12], %12 {strides = array<i32>} : memref<64x128xf32, #tpu.memory_space<vmem>>, vector<64x128xf32>,
    } else {
    }
    %c0 = arith.constant 0 : index
    %c0_1 = arith.constant 0 : index
    %3 = vector.load %arg8[%c0, %c0_1] : memref<64x128xf32, #tpu.memory_space<vmem>>, vector<64x128xf32>
    %c0_2 = arith.constant 0 : index
    %c0_3 = arith.constant 0 : index
    %4 = vector.load %arg2[%c0_2, %c0_3] : memref<64x512xbf16, #tpu.memory_space<vmem>>, vector<64x512xbf16>
    %c0_4 = arith.constant 0 : index
    %c0_5 = arith.constant 0 : index
    %5 = vector.load %arg3[%c0_4, %c0_5] : memref<512x128xbf16, #tpu.memory_space<vmem>>, vector<512x128xbf16>
    %cst = arith.constant dense<0.000000e+00> : vector<64x128xf32>
    %6 = tpu.matmul %4, %5, %cst {dimension_numbers = #tpu.dot_dimension_numbers<[1], [0], [0], [1], [0, 0, 1, 1], [], []>} : vector<64x512xbf16>, vector<512x128xbf16>, vector<64x128xf32> -> vector<64x128xf32>
    %7 = arith.addf %3, %6 : vector<64x128xf32>
    %c0_6 = arith.constant 0 : index
    %c0_7 = arith.constant 0 : index
    %8 = vector.load %arg8[%c0_6, %c0_7] : memref<64x128xf32, #tpu.memory_space<vmem>>, vector<64x128xf32>
    tpu.vector_store %arg8[%c0_6, %c0_7], %7 {strides = array<i32>} : memref<64x128xf32, #tpu.memory_space<vmem>>, vector<64x128xf32>,
    %c0_i32_8 = arith.constant 0 : i32
    %9 = arith.cmpi eq, %arg1, %c0_i32_8 : i32
    %10 = arith.extui %9 : i1 to i32
    %c0_i32_9 = arith.constant 0 : i32
    %11 = arith.cmpi ne, %10, %c0_i32_9 : i32
    scf.if %11 {
      %c0_10 = arith.constant 0 : index
      %c0_11 = arith.constant 0 : index
      %12 = vector.load %arg8[%c0_10, %c0_11] : memref<64x128xf32, #tpu.memory_space<vmem>>, vector<64x128xf32>
      %c0_12 = arith.constant 0 : index
      %c0_13 = arith.constant 0 : index
      %13 = vector.load %arg4[%c0_12, %c0_13] : memref<64x128xf32, #tpu.memory_space<vmem>>, vector<64x128xf32>
      %14 = arith.addf %12, %13 : vector<64x128xf32>
      %cst_14 = arith.constant 0.000000e+00 : f32
      %15 = vector.broadcast %cst_14 : f32 to vector<64x128xf32>
      %16 = arith.maximumf %14, %15 : vector<64x128xf32>
      %17 = arith.truncf %16 : vector<64x128xf32> to vector<64x128xbf16>
      %c0_15 = arith.constant 0 : index
      %c0_16 = arith.constant 0 : index
      %18 = vector.load %arg5[%c0_15, %c0_16] : memref<128x512xbf16, #tpu.memory_space<vmem>>, vector<128x512xbf16>
      %cst_17 = arith.constant dense<0.000000e+00> : vector<64x512xf32>
      %19 = tpu.matmul %17, %18, %cst_17 {dimension_numbers = #tpu.dot_dimension_numbers<[1], [0], [0], [1], [0, 0, 1, 1], [], []>} : vector<64x128xbf16>, vector<128x512xbf16>, vector<64x512xf32> -> vector<64x512xf32>
      %c0_18 = arith.constant 0 : index
      %c0_19 = arith.constant 0 : index
      %20 = vector.load %arg6[%c0_18, %c0_19] : memref<1x512xf32, #tpu.memory_space<vmem>>, vector<1x512xf32>
      %21 = vector.broadcast %20 : vector<1x512xf32> to vector<64x512xf32>
      %22 = arith.addf %19, %21 : vector<64x512xf32>
      %c0_20 = arith.constant 0 : index
      %c0_21 = arith.constant 0 : index
      %23 = vector.load %arg7[%c0_20, %c0_21] : memref<64x512xf32, #tpu.memory_space<vmem>>, vector<64x512xf32>
      tpu.vector_store %arg7[%c0_20, %c0_21], %22 {strides = array<i32>} : memref<64x512xf32, #tpu.memory_space<vmem>>, vector<64x512xf32>,
    } else {
    }
    return
  }
  func.func @transform_0(%arg0: i32, %arg1: i32) -> (i32, i32) {
    %c0_i32 = arith.constant 0 : i32
    return %arg0, %arg1 : i32, i32
  }
  func.func @transform_1(%arg0: i32, %arg1: i32) -> (i32, i32) {
    %c0_i32 = arith.constant 0 : i32
    %c0_i32_0 = arith.constant 0 : i32
    return %arg1, %c0_i32 : i32, i32
  }
  func.func @transform_2(%arg0: i32, %arg1: i32) -> (i32, i32) {
    %c0_i32 = arith.constant 0 : i32
    %c0_i32_0 = arith.constant 0 : i32
    return %arg0, %c0_i32 : i32, i32
  }
  func.func @transform_3(%arg0: i32, %arg1: i32) -> (i32, i32) {
    %c0_i32 = arith.constant 0 : i32
    %c0_i32_0 = arith.constant 0 : i32
    %c0_i32_1 = arith.constant 0 : i32
    return %c0_i32, %c0_i32_0 : i32, i32
  }
  func.func @transform_4(%arg0: i32, %arg1: i32) -> (i32, i32) {
    %c0_i32 = arith.constant 0 : i32
    %c0_i32_0 = arith.constant 0 : i32
    %c0_i32_1 = arith.constant 0 : i32
    return %c0_i32, %c0_i32_0 : i32, i32
  }
  func.func @transform_5(%arg0: i32, %arg1: i32) -> (i32, i32) {
    %c0_i32 = arith.constant 0 : i32
    %c0_i32_0 = arith.constant 0 : i32
    return %arg0, %c0_i32 : i32, i32
  }
}

</mosaic_0001>

<bundles_post_ra>
// kernel: combined_network_forward.1
= control target key start
LH: loop header
LB: loop body
LE: loop exit
PB: predicated region body
PF: predicated region fallthrough
CT: control target
= control target key end

     0   :  { %s1629_s0 = inlined_call_operand.vmem [shape: bf16[64,512], index: 0, kind: input, shape index: {}]   ;;  %s1630_s1 = inlined_call_operand.vmem [shape: bf16[512,128], index: 1, kind: input, shape index: {}]   ;;  %s1631_s2 = inlined_call_operand.vmem [shape: f32[64,128], index: 2, kind: input, shape index: {}]   ;;  %s1632_s3 = inlined_call_operand.vmem [shape: bf16[128,512], index: 3, kind: input, shape index: {}]   ;;  %s1633_s4 = inlined_call_operand.vmem [shape: f32[1,512], index: 4, kind: input, shape index: {}]   ;;  %s1634_s5 = inlined_call_operand.hbm [shape: f32[64,512], index: 5, kind: output, shape index: {}]  }
   0x1   :  { %v1151_v0 = vld [vmem:[%s1630_s1 + $0x78] sm:$0xff]   ;;  %v1155_v4 = vld [vmem:[%s1630_s1 + $0x70] sm:$0xff]   ;;  %v1159_v8 = vld [vmem:[%s1630_s1 + $0x68] sm:$0xff]  }
   0x2   :  { %v1152_v1 = vld [vmem:[%s1630_s1 + $0xf8] sm:$0xff]   ;;  %1067 = vmatprep.subr.bf16.mxu0 %v1151_v0  ;;  %v1156_v5 = vld [vmem:[%s1630_s1 + $0xf0] sm:$0xff]   ;;  %v1160_v9 = vld [vmem:[%s1630_s1 + $0xe8] sm:$0xff]  }
   0x3   :  { %v1153_v2 = vld [vmem:[%s1630_s1 + $0x38] sm:$0xff]   ;;  %1107 = vmatprep.subr.bf16.mxu1 %v1152_v1  ;;  %v1157_v6 = vld [vmem:[%s1630_s1 + $0x30] sm:$0xff]   ;;  %v1161_v10 = vld [vmem:[%s1630_s1 + $0x28] sm:$0xff]  }
   0x4   :  { %v1154_v3 = vld [vmem:[%s1630_s1 + $0xb8] sm:$0xff]   ;;  %1068 = vmatpush3.bf16.msra.mxu0 %v1153_v2  ;;  %v1158_v7 = vld [vmem:[%s1630_s1 + $0xb0] sm:$0xff]   ;;  %v1162_v11 = vld [vmem:[%s1630_s1 + $0xa8] sm:$0xff]  }
   0x5   :  { %1108 = vmatpush3.bf16.msra.mxu1 %v1154_v3  ;;  %1069 = vmatprep.subr.bf16.mxu0 %v1155_v4  ;;  %v1163_v12 = vld [vmem:[%s1630_s1 + $0x60] sm:$0xff]   ;;  %v1167_v16 = vld [vmem:[%s1630_s1 + $0x58] sm:$0xff]   ;;  %v1171_v20 = vld [vmem:[%s1630_s1 + $0x50] sm:$0xff]  }
   0x6   :  { %1109 = vmatprep.subr.bf16.mxu1 %v1156_v5  ;;  %v1164_v13 = vld [vmem:[%s1630_s1 + $0xe0] sm:$0xff]   ;;  %v1168_v17 = vld [vmem:[%s1630_s1 + $0xd8] sm:$0xff]   ;;  %v1172_v21 = vld [vmem:[%s1630_s1 + $0xd0] sm:$0xff]  }
   0x7   :  { %v1165_v14 = vld [vmem:[%s1630_s1 + $0x20] sm:$0xff]   ;;  %v1169_v18 = vld [vmem:[%s1630_s1 + $0x18] sm:$0xff]   ;;  %v1173_v22 = vld [vmem:[%s1630_s1 + $0x10] sm:$0xff]  }
   0x8   :  { %1070 = vmatpush3.bf16.msra.mxu0 %v1157_v6  ;;  %v1166_v15 = vld [vmem:[%s1630_s1 + $0xa0] sm:$0xff]   ;;  %v1170_v19 = vld [vmem:[%s1630_s1 + $0x98] sm:$0xff]   ;;  %v1174_v23 = vld [vmem:[%s1630_s1 + $0x90] sm:$0xff]  }
   0x9   :  { %1110 = vmatpush3.bf16.msra.mxu1 %v1158_v7  ;;  %1071 = vmatprep.subr.bf16.mxu0 %v1159_v8  ;;  %v1175_v24 = vld [vmem:[%s1630_s1 + $0x48] sm:$0xff]   ;;  %v1179_v28 = vld [vmem:[%s1630_s1 + $0x40] sm:$0xff]  }
   0xa   :  { %1111 = vmatprep.subr.bf16.mxu1 %v1160_v9  ;;  %v1176_v25 = vld [vmem:[%s1630_s1 + $0xc8] sm:$0xff]   ;;  %v1180_v29 = vld [vmem:[%s1630_s1 + $0xc0] sm:$0xff]  }
   0xb   :  { %v1177_v26 = vld [vmem:[%s1630_s1 + $0x8] sm:$0xff]   ;;  %v1181_v30 = vld [vmem:[%s1630_s1] sm:$0xff]  }
   0xc   :  { %1072 = vmatpush3.bf16.msra.mxu0 %v1161_v10  ;;  %v1178_v27 = vld [vmem:[%s1630_s1 + $0x88] sm:$0xff]   ;;  %v1182_v31 = vld [vmem:[%s1630_s1 + $0x80] sm:$0xff]  }
   0xd   :  { %1112 = vmatpush3.bf16.msra.mxu1 %v1162_v11  ;;  %1073 = vmatprep.subr.bf16.mxu0 %v1163_v12  ;;  %v1183_v32 = vld [vmem:[%s1629_s0] ss:$16 sps:$4 sm:$0xff]   ;;  %v1185_v33 = vld [vmem:[%s1629_s0 + $0x4] ss:$16 sps:$4 sm:$0xff]   ;;  %v1186_v34 = vld [vmem:[%s1629_s0 + $0x8] ss:$16 sps:$4 sm:$0xff]  }
   0xe   :  { %1113 = vmatprep.subr.bf16.mxu1 %v1164_v13  ;;  %v1188_v35 = vld [vmem:[%s1629_s0 + $0xc] ss:$16 sps:$4 sm:$0xff]   ;;  %426 = vmatprep.mubr.bf16.mxu0 %v1185_v33  ;;  %v1189_v36 = vld [vmem:[%s1629_s0 + $0x24] ss:$16 sps:$4 sm:$0xff]   ;;  %v1193_v38 = vld [vmem:[%s1629_s0 + $0x20] ss:$16 sps:$4 sm:$0xff]  }
   0xf   :  { %491 = vmatprep.mubr.bf16.mxu1 %v1188_v35  ;;  %v1191_v37 = vld [vmem:[%s1629_s0 + $0x2c] ss:$16 sps:$4 sm:$0xff]   ;;  %v1194_v39 = vld [vmem:[%s1629_s0 + $0x28] ss:$16 sps:$4 sm:$0xff]   ;;  %v1195_v40 = vld [vmem:[%s1629_s0 + $0x44] ss:$16 sps:$4 sm:$0xff]  }
  0x10   :  { %1074 = vmatpush3.bf16.msra.mxu0 %v1165_v14  ;;  %v1197_v41 = vld [vmem:[%s1629_s0 + $0x4c] ss:$16 sps:$4 sm:$0xff]   ;;  %v1207_v42 = vld [vmem:[%s1632_s3 + $0xe0] ss:$16 sps:$4 sm:$0xff]   ;;  %v1209_v43 = vld [vmem:[%s1632_s3 + $0xe4] ss:$16 sps:$4 sm:$0xff]  }
  0x11   :  { %1114 = vmatpush3.bf16.msra.mxu1 %v1166_v15  ;;  %1075 = vmatprep.subr.bf16.mxu0 %v1167_v16  ;;  %v1210_v44 = vld [vmem:[%s1632_s3 + $0xe8] ss:$16 sps:$4 sm:$0xff]   ;;  %v1212_v45 = vld [vmem:[%s1632_s3 + $0xec] ss:$16 sps:$4 sm:$0xff]   ;;  %v1199_v46 = vld [vmem:[%s1629_s0 + $0x40] ss:$16 sps:$4 sm:$0xff]  }
  0x12   :  { %1115 = vmatprep.subr.bf16.mxu1 %v1168_v17  ;;  %v1215_v47 = vld [vmem:[%s1632_s3 + $0xc4] ss:$16 sps:$4 sm:$0xff]   ;;  %v1200_v48 = vld [vmem:[%s1629_s0 + $0x48] ss:$16 sps:$4 sm:$0xff]   ;;  %v1213_v50 = vld [vmem:[%s1632_s3 + $0xc0] ss:$16 sps:$4 sm:$0xff]  }
  0x13   :  { %v1201_v49 = vld [vmem:[%s1629_s0 + $0x64] ss:$16 sps:$4 sm:$0xff]   ;;  %v1218_v51 = vld [vmem:[%s1632_s3 + $0xcc] ss:$16 sps:$4 sm:$0xff]   ;;  %v1216_v52 = vld [vmem:[%s1632_s3 + $0xc8] ss:$16 sps:$4 sm:$0xff]  }
  0x14   :  { %1076 = vmatpush3.bf16.msra.mxu0 %v1169_v18  ;;  %v1203_v53 = vld [vmem:[%s1629_s0 + $0x6c] ss:$16 sps:$4 sm:$0xff]   ;;  %v1219_v54 = vld [vmem:[%s1632_s3 + $0xa0] ss:$16 sps:$4 sm:$0xff]   ;;  %v1221_v55 = vld [vmem:[%s1632_s3 + $0xa4] ss:$16 sps:$4 sm:$0xff]  }
  0x15   :  { %1116 = vmatpush3.bf16.msra.mxu1 %v1170_v19  ;;  %1077 = vmatprep.subr.bf16.mxu0 %v1171_v20  ;;  %v1222_v56 = vld [vmem:[%s1632_s3 + $0xa8] ss:$16 sps:$4 sm:$0xff]   ;;  %v1224_v57 = vld [vmem:[%s1632_s3 + $0xac] ss:$16 sps:$4 sm:$0xff]   ;;  %v1227_v58 = vld [vmem:[%s1632_s3 + $0x84] ss:$16 sps:$4 sm:$0xff]  }
  0x16   :  { %1117 = vmatprep.subr.bf16.mxu1 %v1172_v21  ;;  %v1225_v59 = vld [vmem:[%s1632_s3 + $0x80] ss:$16 sps:$4 sm:$0xff]   ;;  %v1230_v60 = vld [vmem:[%s1632_s3 + $0x8c] ss:$16 sps:$4 sm:$0xff]   ;;  %v1228_v62 = vld [vmem:[%s1632_s3 + $0x88] ss:$16 sps:$4 sm:$0xff]  }
  0x17   :  { %v1205_v61 = vld [vmem:[%s1629_s0 + $0x60] ss:$16 sps:$4 sm:$0xff]   ;;  %v1206_v63 = vld [vmem:[%s1629_s0 + $0x68] ss:$16 sps:$4 sm:$0xff]  }
  0x18   :  { %1078 = vmatpush3.bf16.msra.mxu0 %v1173_v22 }
  0x19   :  { %1118 = vmatpush3.bf16.msra.mxu1 %v1174_v23  ;;  %1079 = vmatprep.subr.bf16.mxu0 %v1175_v24 }
  0x1a   :  { %1119 = vmatprep.subr.bf16.mxu1 %v1176_v25 }
  0x1c   :  { %1080 = vmatpush3.bf16.msra.mxu0 %v1177_v26 }
  0x1d   :  { %1120 = vmatpush3.bf16.msra.mxu1 %v1178_v27  ;;  %1081 = vmatprep.subr.bf16.mxu0 %v1179_v28 }
  0x1e   :  { %1121 = vmatprep.subr.bf16.mxu1 %v1180_v29 }
  0x20   :  { %1082 = vmatpush3.bf16.msra.mxu0 %v1181_v30 }
  0x21   :  { %1122 = vmatpush3.bf16.msra.mxu1 %v1182_v31  ;;  %793 = vmatprep.subr.bf16.mxu0 %v1209_v43 }
  0x22   :  { %866 = vmatprep.subr.bf16.mxu1 %v1212_v45 }
  0x23   :  { %427 = vmatmul.mubr.bf16.vlgmr.msra.gmra.mxu0 %v1183_v32 }
  0x24   :  { %492 = vmatmul.mubr.bf16.vlgmr.msra.gmra.mxu1 %v1186_v34  ;;  %434 = vmatprep.mubr.bf16.mxu0 %v1189_v36 }
  0x25   :  { %499 = vmatprep.mubr.bf16.mxu1 %v1191_v37  ;;  %794 = vmatpush1.bf16.msra.mxu0 %v1207_v42 }
  0x26   :  { %867 = vmatpush1.bf16.msra.mxu1 %v1210_v44  ;;  %795 = vmatprep.subr.bf16.mxu0 %v1215_v47 }
  0x27   :  { %868 = vmatprep.subr.bf16.mxu1 %v1218_v51 }
  0x29   :  { %796 = vmatpush1.bf16.msra.mxu0 %v1213_v50 }
  0x2a   :  { %869 = vmatpush1.bf16.msra.mxu1 %v1216_v52  ;;  %797 = vmatprep.subr.bf16.mxu0 %v1221_v55 }
  0x2b   :  { %435 = vmatmul.mubr.bf16.gmra.mxu0 %v1193_v38  ;;  %870 = vmatprep.subr.bf16.mxu1 %v1224_v57 }
  0x2c   :  { %500 = vmatmul.mubr.bf16.gmra.mxu1 %v1194_v39  ;;  %442 = vmatprep.mubr.bf16.mxu0 %v1195_v40 }
  0x2d   :  { %507 = vmatprep.mubr.bf16.mxu1 %v1197_v41  ;;  %798 = vmatpush1.bf16.msra.mxu0 %v1219_v54 }
  0x2e   :  { %871 = vmatpush1.bf16.msra.mxu1 %v1222_v56  ;;  %799 = vmatprep.subr.bf16.mxu0 %v1227_v58 }
  0x2f   :  { %872 = vmatprep.subr.bf16.mxu1 %v1230_v60 }
  0x33   :  { %443 = vmatmul.mubr.bf16.gmra.mxu0 %v1199_v46 }
  0x34   :  { %508 = vmatmul.mubr.bf16.gmra.mxu1 %v1200_v48  ;;  %450 = vmatprep.mubr.bf16.mxu0 %v1201_v49 }
  0x35   :  { %515 = vmatprep.mubr.bf16.mxu1 %v1203_v53 }
  0x36   :  { %10 = vsyncpa [#allocation4], 0  ;;  %800 = vmatpush1.bf16.msra.mxu0 %v1225_v59  ;;  %873 = vmatpush1.bf16.msra.mxu1 %v1228_v62  ;;  %v1233_v0 = vld [vmem:[%s1632_s3 + $0x64] ss:$16 sps:$4 sm:$0xff]   ;;  %v1236_v1 = vld [vmem:[%s1632_s3 + $0x6c] ss:$16 sps:$4 sm:$0xff]  }
  0x37   :  { %v1231_v2 = vld [vmem:[%s1632_s3 + $0x60] ss:$16 sps:$4 sm:$0xff]   ;;  %v1234_v3 = vld [vmem:[%s1632_s3 + $0x68] ss:$16 sps:$4 sm:$0xff]   ;;  %801 = vmatprep.subr.bf16.mxu0 %v1233_v0  ;;  %874 = vmatprep.subr.bf16.mxu1 %v1236_v1  ;;  %v1239_v4 = vld [vmem:[%s1632_s3 + $0x44] ss:$16 sps:$4 sm:$0xff]  }
  0x38   :  { %v1242_v5 = vld [vmem:[%s1632_s3 + $0x4c] ss:$16 sps:$4 sm:$0xff]   ;;  %v1237_v6 = vld [vmem:[%s1632_s3 + $0x40] ss:$16 sps:$4 sm:$0xff]   ;;  %v1240_v7 = vld [vmem:[%s1632_s3 + $0x48] ss:$16 sps:$4 sm:$0xff]  }
  0x39   :  { %v1245_v8 = vld [vmem:[%s1632_s3 + $0x24] ss:$16 sps:$4 sm:$0xff]   ;;  %v1248_v9 = vld [vmem:[%s1632_s3 + $0x2c] ss:$16 sps:$4 sm:$0xff]   ;;  %v1243_v10 = vld [vmem:[%s1632_s3 + $0x20] ss:$16 sps:$4 sm:$0xff]  }
  0x3a   :  { %802 = vmatpush1.bf16.msra.mxu0 %v1231_v2  ;;  %875 = vmatpush1.bf16.msra.mxu1 %v1234_v3  ;;  %v1246_v11 = vld [vmem:[%s1632_s3 + $0x28] ss:$16 sps:$4 sm:$0xff]   ;;  %v1251_v12 = vld [vmem:[%s1632_s3 + $0x4] ss:$16 sps:$4 sm:$0xff]   ;;  %v1254_v13 = vld [vmem:[%s1632_s3 + $0xc] ss:$16 sps:$4 sm:$0xff]  }
  0x3b   :  { %451 = vmatmul.mubr.bf16.gmra.mxu0 %v1205_v61  ;;  %803 = vmatprep.subr.bf16.mxu0 %v1239_v4  ;;  %v1249_v14 = vld [vmem:[%s1632_s3] ss:$16 sps:$4 sm:$0xff]   ;;  %v1252_v15 = vld [vmem:[%s1632_s3 + $0x8] ss:$16 sps:$4 sm:$0xff]   ;;  %v1277_v16 = vmov 0  }
  0x3c   :  { %516 = vmatmul.mubr.bf16.gmra.mxu1 %v1206_v63  ;;  %876 = vmatprep.subr.bf16.mxu1 %v1242_v5  ;;  %v551_v27 = vld [vmem:[%s1631_s2] sm:$0xff]  ;;  %v552_v32 = vld [vmem:[%s1631_s2 + $0x8] sm:$0xff]  ;;  %v553_v47 = vld [vmem:[%s1631_s2 + $0x10] sm:$0xff] }
  0x3d   :  { %825 = vmatprep.mubr.bf16.mxu0 %v1277_v16  ;;  %898 = vmatprep.mubr.bf16.mxu1 %v1277_v16  ;;  %v554_v53 = vld [vmem:[%s1631_s2 + $0x18] sm:$0xff]  ;;  %v555_v4 = vld [vmem:[%s1631_s2 + $0x20] sm:$0xff] }
  0x3e   :  { %804 = vmatpush1.bf16.msra.mxu0 %v1237_v6  ;;  %877 = vmatpush1.bf16.msra.mxu1 %v1240_v7 }
  0x3f   :  { %805 = vmatprep.subr.bf16.mxu0 %v1245_v8  ;;  %878 = vmatprep.subr.bf16.mxu1 %v1248_v9 }
  0x42   :  { %806 = vmatpush1.bf16.msra.mxu0 %v1243_v10  ;;  %879 = vmatpush1.bf16.msra.mxu1 %v1246_v11  ;;  %v556_v10 = vld [vmem:[%s1631_s2 + $0x28] sm:$0xff] }
  0x43   :  { %807 = vmatprep.subr.bf16.mxu0 %v1251_v12  ;;  %880 = vmatprep.subr.bf16.mxu1 %v1254_v13 }
  0x46   :  { %808 = vmatpush1.bf16.msra.mxu0 %v1249_v14  ;;  %881 = vmatpush1.bf16.msra.mxu1 %v1252_v15 }
  0xe3   :  { %v1083_v17 = vpop.f32.mrf.mxu0 }
  0xe4   :  { %v1123_v18 = vpop.f32.mrf.mxu1 }
  0xe5   :  { %v1084_v19 = vpop.f32.mrf.mxu0 }
  0xe6   :  { %v1085_v20 = vadd.f32 %v1084_v19, %v1083_v17  ;;  %v1124_v21 = vpop.f32.mrf.mxu1 }
  0xe7   :  { %v1125_v22 = vadd.f32 %v1124_v21, %v1123_v18  ;;  %v1086_v23 = vpop.f32.mrf.mxu0 }
  0xe8   :  { %v1126_v24 = vpop.f32.mrf.mxu1 }
  0xe9   :  { %v494_v25 = vadd.f32 %v1125_v22, %v1085_v20  ;;  %v1087_v26 = vpop.f32.mrf.mxu0 }
  0xea   :  { %v1088_v28 = vadd.f32 %v1087_v26, %v1086_v23  ;;  %v1127_v29 = vpop.f32.mrf.mxu1  ;;  %v557_v26 = vld [vmem:[%s1631_s2 + $0x30] sm:$0xff] }
  0xeb   :  { %v1128_v30 = vadd.f32 %v1127_v29, %v1126_v24  ;;  %v1089_v31 = vpop.f32.mrf.mxu0  ;;  %v559_v34 = vadd.f32 %v551_v27, %v494_v25 }
  0xec   :  { %v1129_v33 = vpop.f32.mrf.mxu1 }
  0xed   :  { %v497_v35 = vadd.f32 %v1128_v30, %v1088_v28  ;;  %v1090_v36 = vpop.f32.mrf.mxu0  ;;  %v567_v43 = vmax.f32 %v559_v34, 0.0 }
  0xee   :  { %v1091_v37 = vadd.f32 %v1090_v36, %v1089_v31  ;;  %v1130_v38 = vpop.f32.mrf.mxu1  ;;  %v558_v31 = vld [vmem:[%s1631_s2 + $0x38] sm:$0xff] }
  0xef   :  { %v560_v39 = vadd.f32 %v552_v32, %v497_v35  ;;  %v1131_v40 = vadd.f32 %v1130_v38, %v1129_v33  ;;  %v1092_v41 = vpop.f32.mrf.mxu0  ;;  %v613_v38 = vlaneseq }
  0xf0   :  { %v1132_v42 = vpop.f32.mrf.mxu1 }
  0xf1   :  { %v568_v44 = vmax.f32 %v560_v39, 0.0  ;;  %v502_v45 = vadd.f32 %v1131_v40, %v1091_v37  ;;  %v1093_v46 = vpop.f32.mrf.mxu0  ;;  %v614_v39 = vshrl.u32 %v613_v38, 7 }
  0xf2   :  { %v1094_v48 = vadd.f32 %v1093_v46, %v1092_v41  ;;  %v1133_v49 = vpop.f32.mrf.mxu1 }
  0xf3   :  { %v575_v50 = vpack.c.bf16 %v568_v44, %v567_v43  ;;  %v1134_v51 = vadd.f32 %v1133_v49, %v1132_v42  ;;  %v1095_v52 = vpop.f32.mrf.mxu0  ;;  %v561_v55 = vadd.f32 %v553_v47, %v502_v45  ;;  %v615_v40 = vsub.s32 0, %v614_v39  ;;  %v611_v42 = vld [vmem:[%s1633_s4] sm:$0xf]  ;;  %s1278_s4 = smov [#allocation3]  }
  0xf4   :  { %v1135_v54 = vpop.f32.mrf.mxu1  ;;  %v623_v41 = vsub.s32 2, %v614_v39  ;;  %v619_v43 = vsub.s32 1, %v614_v39  ;;  %v627_v44 = vsub.s32 3, %v614_v39  ;;  %s976_s13 = sshll.u32 %s1278_s4, 4  ;;  %s977_s13 = int_to_ptr.vmem [resolvable:$true] %s976_s13 }
  0xf5   :  { %v505_v56 = vadd.f32 %v1134_v51, %v1094_v48  ;;  %826 = vmatmul.mubr.bf16.vlgmr.msra.gmra.mxu0 %v575_v50  ;;  %899 = vmatmul.mubr.bf16.vlgmr.msra.gmra.mxu1 %v575_v50  ;;  %v1096_v57 = vpop.f32.mrf.mxu0  ;;  %v569_v0 = vmax.f32 %v561_v55, 0.0  ;;  %v1586_v45 = vrot.slane %v611_v42, %v615_v40  ;;  %s1255_s14 = scalar_lea.vmem %s977_s13, 4096  ;;  %p1260_p1 = scmp.lt.s32.totalorder %s977_s13, %s977_s13 }
  0xf6   :  { %v1097_v58 = vadd.f32 %v1096_v57, %v1095_v52  ;;  %v1136_v59 = vpop.f32.mrf.mxu1  ;;  %835 = vmatprep.mubr.bf16.mxu0 %v1277_v16  ;;  %908 = vmatprep.mubr.bf16.mxu1 %v1277_v16  ;;  %v1588_v46 = vrot.slane %v611_v42, %v623_v41  ;;  %v1592_v47 = vrot.slane %v611_v42, %v627_v44  ;;  %p1256_p0 = scmp.ne.s32.totalorder %s977_s13, %s1255_s14  ;;  %p1261_p2 = scmp.lt.s32.totalorder %s1255_s14, %s1255_s14 }
  0xf7   :  { %v562_v60 = vadd.f32 %v554_v53, %v505_v56  ;;  %v1137_v61 = vadd.f32 %v1136_v59, %v1135_v54  ;;  %v1098_v62 = vpop.f32.mrf.mxu0 }
  0xf8   :  { %v1138_v63 = vpop.f32.mrf.mxu1  ;;  %p1262_p3 = por %p1261_p2, %p1260_p1 }
  0xf9   :  { %v570_v1 = vmax.f32 %v562_v60, 0.0  ;;  %v510_v2 = vadd.f32 %v1137_v61, %v1097_v58  ;;  %v1099_v3 = vpop.f32.mrf.mxu0 }
  0xfa   :  { %v1100_v5 = vadd.f32 %v1099_v3, %v1098_v62  ;;  %v1139_v6 = vpop.f32.mrf.mxu1  ;;  %p1263_p4 = pnand %p1262_p3, %p1256_p0 }
  0xfb   :  { %v1140_v7 = vadd.f32 %v1139_v6, %v1138_v63  ;;  %v1101_v8 = vpop.f32.mrf.mxu0  ;;  %v576_v9 = vpack.c.bf16 %v570_v1, %v569_v0  ;;  %v563_v12 = vadd.f32 %v555_v4, %v510_v2 }
  0xfc   :  { %v1141_v11 = vpop.f32.mrf.mxu1 }
  0xfd   :  { %v513_v13 = vadd.f32 %v1140_v7, %v1100_v5  ;;  %836 = vmatmul.mubr.bf16.gmra.mxu0 %v576_v9  ;;  %909 = vmatmul.mubr.bf16.gmra.mxu1 %v576_v9  ;;  %v1102_v14 = vpop.f32.mrf.mxu0  ;;  %v571_v22 = vmax.f32 %v563_v12, 0.0 }
  0xfe   :  { %v1103_v15 = vadd.f32 %v1102_v14, %v1101_v8  ;;  %v1142_v17 = vpop.f32.mrf.mxu1  ;;  %845 = vmatprep.mubr.bf16.mxu0 %v1277_v16  ;;  %918 = vmatprep.mubr.bf16.mxu1 %v1277_v16 }
  0xff   :  { %v564_v18 = vadd.f32 %v556_v10, %v513_v13  ;;  %v1143_v19 = vadd.f32 %v1142_v17, %v1141_v11  ;;  %v1104_v20 = vpop.f32.mrf.mxu0 }
 0x100   :  { %v1144_v21 = vpop.f32.mrf.mxu1 }
 0x101   :  { %v572_v23 = vmax.f32 %v564_v18, 0.0  ;;  %v518_v24 = vadd.f32 %v1143_v19, %v1103_v15  ;;  %v1105_v25 = vpop.f32.mrf.mxu0 }
 0x102   :  { %v1106_v27 = vadd.f32 %v1105_v25, %v1104_v20  ;;  %v1145_v28 = vpop.f32.mrf.mxu1 }
 0x103   :  { %v1146_v29 = vadd.f32 %v1145_v28, %v1144_v21  ;;  %v577_v30 = vpack.c.bf16 %v572_v23, %v571_v22  ;;  %v565_v32 = vadd.f32 %v557_v26, %v518_v24 }
 0x105   :  { %v521_v33 = vadd.f32 %v1146_v29, %v1106_v27  ;;  %846 = vmatmul.mubr.bf16.gmra.mxu0 %v577_v30  ;;  %919 = vmatmul.mubr.bf16.gmra.mxu1 %v577_v30  ;;  %v573_v35 = vmax.f32 %v565_v32, 0.0 }
 0x106   :  { %855 = vmatprep.mubr.bf16.mxu0 %v1277_v16  ;;  %928 = vmatprep.mubr.bf16.mxu1 %v1277_v16  ;;  %v1590_v16 = vrot.slane %v611_v42, %v619_v43 }
 0x107   :  { %v566_v34 = vadd.f32 %v558_v31, %v521_v33 }
 0x109   :  { %v574_v36 = vmax.f32 %v566_v34, 0.0 }
 0x10b   :  { %v578_v37 = vpack.c.bf16 %v574_v36, %v573_v35 }
 0x10d   :  { %856 = vmatmul.mubr.bf16.gmra.mxu0 %v578_v37  ;;  %929 = vmatmul.mubr.bf16.gmra.mxu1 %v578_v37 }
 0x1b5   :  { %v827_v48 = vpop.f32.mrf.mxu0  ;;  %v900_v49 = vpop.f32.mrf.mxu1 }
 0x1b6   :  { %v828_v50 = vadd.f32 %v827_v48, %v1586_v45  ;;  %v901_v51 = vadd.f32 %v900_v49, %v1588_v46 }
 0x1b7   :  { %v829_v52 = vpop.f32.mrf.mxu0  ;;  %v902_v53 = vpop.f32.mrf.mxu1 }
 0x1b8   :  { %939 = vst [vmem:[#allocation3] sm:$0xff] %v828_v50  ;;  %941 = vst [vmem:[#allocation3 + $0x10] sm:$0xff] %v901_v51  ;;  %v830_v54 = vadd.f32 %v829_v52, %v1590_v16  ;;  %v903_v55 = vadd.f32 %v902_v53, %v1592_v47 }
 0x1b9   :  { %v831_v56 = vpop.f32.mrf.mxu0  ;;  %v904_v57 = vpop.f32.mrf.mxu1 }
 0x1ba   :  { %940 = vst [vmem:[#allocation3 + $0x8] sm:$0xff] %v830_v54  ;;  %942 = vst [vmem:[#allocation3 + $0x18] sm:$0xff] %v903_v55  ;;  %v832_v58 = vadd.f32 %v831_v56, %v1586_v45  ;;  %v905_v59 = vadd.f32 %v904_v57, %v1588_v46 }
 0x1bb   :  { %v833_v60 = vpop.f32.mrf.mxu0  ;;  %v906_v61 = vpop.f32.mrf.mxu1 }
 0x1bc   :  { %943 = vst [vmem:[#allocation3 + $0x20] sm:$0xff] %v832_v58  ;;  %945 = vst [vmem:[#allocation3 + $0x30] sm:$0xff] %v905_v59  ;;  %v834_v62 = vadd.f32 %v833_v60, %v1590_v16  ;;  %v907_v63 = vadd.f32 %v906_v61, %v1592_v47 }
 0x1bd   :  { %v837_v0 = vpop.f32.mrf.mxu0  ;;  %v910_v1 = vpop.f32.mrf.mxu1 }
 0x1be   :  { %944 = vst [vmem:[#allocation3 + $0x28] sm:$0xff] %v834_v62  ;;  %946 = vst [vmem:[#allocation3 + $0x38] sm:$0xff] %v907_v63  ;;  %v838_v2 = vadd.f32 %v837_v0, %v1586_v45  ;;  %v911_v3 = vadd.f32 %v910_v1, %v1588_v46 }
 0x1bf   :  { %v839_v4 = vpop.f32.mrf.mxu0  ;;  %v912_v5 = vpop.f32.mrf.mxu1 }
 0x1c0   :  { %947 = vst [vmem:[#allocation3 + $0x40] sm:$0xff] %v838_v2  ;;  %949 = vst [vmem:[#allocation3 + $0x50] sm:$0xff] %v911_v3  ;;  %v840_v6 = vadd.f32 %v839_v4, %v1590_v16  ;;  %v913_v7 = vadd.f32 %v912_v5, %v1592_v47 }
 0x1c1   :  { %v841_v8 = vpop.f32.mrf.mxu0  ;;  %v914_v9 = vpop.f32.mrf.mxu1 }
 0x1c2   :  { %948 = vst [vmem:[#allocation3 + $0x48] sm:$0xff] %v840_v6  ;;  %950 = vst [vmem:[#allocation3 + $0x58] sm:$0xff] %v913_v7  ;;  %v842_v10 = vadd.f32 %v841_v8, %v1586_v45  ;;  %v915_v11 = vadd.f32 %v914_v9, %v1588_v46 }
 0x1c3   :  { %v843_v12 = vpop.f32.mrf.mxu0  ;;  %v916_v13 = vpop.f32.mrf.mxu1 }
 0x1c4   :  { %951 = vst [vmem:[#allocation3 + $0x60] sm:$0xff] %v842_v10  ;;  %953 = vst [vmem:[#allocation3 + $0x70] sm:$0xff] %v915_v11  ;;  %v844_v14 = vadd.f32 %v843_v12, %v1590_v16  ;;  %v917_v15 = vadd.f32 %v916_v13, %v1592_v47 }
 0x1c5   :  { %v847_v17 = vpop.f32.mrf.mxu0  ;;  %v920_v18 = vpop.f32.mrf.mxu1 }
 0x1c6   :  { %952 = vst [vmem:[#allocation3 + $0x68] sm:$0xff] %v844_v14  ;;  %954 = vst [vmem:[#allocation3 + $0x78] sm:$0xff] %v917_v15  ;;  %v848_v19 = vadd.f32 %v847_v17, %v1586_v45  ;;  %v921_v20 = vadd.f32 %v920_v18, %v1588_v46 }
 0x1c7   :  { %v849_v21 = vpop.f32.mrf.mxu0  ;;  %v922_v22 = vpop.f32.mrf.mxu1 }
 0x1c8   :  { %955 = vst [vmem:[#allocation3 + $0x80] sm:$0xff] %v848_v19  ;;  %957 = vst [vmem:[#allocation3 + $0x90] sm:$0xff] %v921_v20  ;;  %v850_v23 = vadd.f32 %v849_v21, %v1590_v16  ;;  %v923_v24 = vadd.f32 %v922_v22, %v1592_v47 }
 0x1c9   :  { %v851_v25 = vpop.f32.mrf.mxu0  ;;  %v924_v26 = vpop.f32.mrf.mxu1 }
 0x1ca   :  { %956 = vst [vmem:[#allocation3 + $0x88] sm:$0xff] %v850_v23  ;;  %958 = vst [vmem:[#allocation3 + $0x98] sm:$0xff] %v923_v24  ;;  %v852_v27 = vadd.f32 %v851_v25, %v1586_v45  ;;  %v925_v28 = vadd.f32 %v924_v26, %v1588_v46 }
 0x1cb   :  { %v853_v29 = vpop.f32.mrf.mxu0  ;;  %v926_v30 = vpop.f32.mrf.mxu1 }
 0x1cc   :  { %959 = vst [vmem:[#allocation3 + $0xa0] sm:$0xff] %v852_v27  ;;  %961 = vst [vmem:[#allocation3 + $0xb0] sm:$0xff] %v925_v28  ;;  %v854_v31 = vadd.f32 %v853_v29, %v1590_v16  ;;  %v927_v32 = vadd.f32 %v926_v30, %v1592_v47 }
 0x1cd   :  { %v857_v33 = vpop.f32.mrf.mxu0  ;;  %v930_v34 = vpop.f32.mrf.mxu1 }
 0x1ce   :  { %960 = vst [vmem:[#allocation3 + $0xa8] sm:$0xff] %v854_v31  ;;  %962 = vst [vmem:[#allocation3 + $0xb8] sm:$0xff] %v927_v32  ;;  %v858_v35 = vadd.f32 %v857_v33, %v1586_v45  ;;  %v931_v36 = vadd.f32 %v930_v34, %v1588_v46 }
 0x1cf   :  { %v859_v37 = vpop.f32.mrf.mxu0  ;;  %v932_v38 = vpop.f32.mrf.mxu1 }
 0x1d0   :  { %963 = vst [vmem:[#allocation3 + $0xc0] sm:$0xff] %v858_v35  ;;  %965 = vst [vmem:[#allocation3 + $0xd0] sm:$0xff] %v931_v36  ;;  %v860_v39 = vadd.f32 %v859_v37, %v1590_v16  ;;  %v933_v40 = vadd.f32 %v932_v38, %v1592_v47 }
 0x1d1   :  { %v861_v41 = vpop.f32.mrf.mxu0  ;;  %v934_v42 = vpop.f32.mrf.mxu1 }
 0x1d2   :  { %964 = vst [vmem:[#allocation3 + $0xc8] sm:$0xff] %v860_v39  ;;  %966 = vst [vmem:[#allocation3 + $0xd8] sm:$0xff] %v933_v40  ;;  %v862_v43 = vadd.f32 %v861_v41, %v1586_v45  ;;  %v935_v44 = vadd.f32 %v934_v42, %v1588_v46 }
 0x1d3   :  { %v863_v48 = vpop.f32.mrf.mxu0  ;;  %v936_v49 = vpop.f32.mrf.mxu1 }
 0x1d4   :  { %967 = vst [vmem:[#allocation3 + $0xe0] sm:$0xff] %v862_v43  ;;  %969 = vst [vmem:[#allocation3 + $0xf0] sm:$0xff] %v935_v44  ;;  %v864_v50 = vadd.f32 %v863_v48, %v1590_v16  ;;  %v937_v51 = vadd.f32 %v936_v49, %v1592_v47 }
 0x1d6   :  { %968 = vst [vmem:[#allocation3 + $0xe8] sm:$0xff] %v864_v50  ;;  %970 = vst [vmem:[#allocation3 + $0xf8] sm:$0xff] %v937_v51 }
 0x1d7   :  { %1266 = shalt.err (!%p1263_p4)
}
 0x1d8   :  { %s1279_s1 = smov 512   ;;  %s1280_s15 = smov 32  }
 0x1d9   :  { %982 = dma.vmem_to_hbm [thread:$0]  %s977_s13, 4096, %s1634_s5, [#allocation4], %s1279_s1, %s1279_s1, %s1280_s15  }
 0x1da   :  { %1275 = dma.done.wait [#allocation4], 4096  }
 0x1db   :  { %1276 = vsyncadd [#allocation4], 4294963200 }
 0x1dc   :  { %986 = vsyncpa [#allocation4], 1 }

</bundles_post_ra>
